<compile_context>
chip_gen: v7x
topology: tpu7x:2x2x1
jax: 0.10.0
libtpu: 0.0.40
codegen_flags: <defaults>
</compile_context>

<pallas_src>
import jax
import jax.numpy as jnp
from jax.experimental import pallas as pl
from jax.experimental.pallas import tpu as pltpu


def mlp_kernel(x_ref, w1_ref, b1_ref, w2_ref, b2_ref, w3_ref, b3_ref, o_ref):
    # Layer 1: Linear(256 -> 16) + ReLU   (bf16 MXU inputs, f32 accumulate)
    x = x_ref[...].astype(jnp.bfloat16)
    h = jnp.dot(x, w1_ref[...], preferred_element_type=jnp.float32)
    h = jnp.maximum(h + b1_ref[...], 0.0)
    # Layer 2: Linear(16 -> 16) + ReLU
    h = jnp.dot(h.astype(jnp.bfloat16), w2_ref[...], preferred_element_type=jnp.float32)
    h = jnp.maximum(h + b2_ref[...], 0.0)
    # Layer 3: Linear(16 -> 16), no activation (logits)
    h = jnp.dot(h.astype(jnp.bfloat16), w3_ref[...], preferred_element_type=jnp.float32)
    o_ref[...] = (h + b3_ref[...]).astype(o_ref.dtype)


def _round_up(a, m):
    return (a + m - 1) // m * m


def ffnn_small_forward(x, params, block_b=8192):
    """x: (B, 256) f32 or bf16. params: dict with bf16 transposed weights, f32 biases."""
    B, F = x.shape
    hidden = params["w1t"].shape[1]
    out_features = params["w3t"].shape[1]

    # Batch tile: multiple of 8 (sublane constraint), clamped for small batches.
    tb = min(block_b, _round_up(B, 8))
    tb = _round_up(max(tb, 8), 8)
    # Ensure >= 2 grid steps when the batch allows it, so the "parallel" batch axis
    # can actually shard across v7x's 2 TensorCores.
    if B > 8 and pl.cdiv(B, tb) < 2:
        tb = _round_up(pl.cdiv(B, 2), 8)

    # Ragged last block is masked by Pallas -> no jnp.pad / out[:B] copies of x.
    grid = (pl.cdiv(B, tb),)

    in_specs = [
        # x: one (tb, 256) tile per grid step (double-buffered by Pallas).
        pl.BlockSpec((tb, F), lambda i: (i, 0)),
        # Weights / biases: constant block index -> stay resident in VMEM.
        pl.BlockSpec(params["w1t"].shape, lambda i: (0, 0)),
        pl.BlockSpec(params["b1"].shape, lambda i: (0, 0)),
        pl.BlockSpec(params["w2t"].shape, lambda i: (0, 0)),
        pl.BlockSpec(params["b2"].shape, lambda i: (0, 0)),
        pl.BlockSpec(params["w3t"].shape, lambda i: (0, 0)),
        pl.BlockSpec(params["b3"].shape, lambda i: (0, 0)),
    ]
    out_spec = pl.BlockSpec((tb, out_features), lambda i: (i, 0))

    # Scheduling hint: HBM-read-bound (~9 FLOP/byte) kernel.
    weight_bytes = sum(int(params[k].size) * params[k].dtype.itemsize for k in params)
    flops = 2 * B * (F * hidden + hidden * hidden + hidden * out_features)
    bytes_accessed = B * F * x.dtype.itemsize + B * out_features * 4 + weight_bytes
    cost = pl.CostEstimate(flops=int(flops), transcendentals=0,
                           bytes_accessed=int(bytes_accessed))

    # VMEM budget: double-buffered x tiles + output tiles + bf16 copy + activations,
    # plus headroom; capped below v7x's 64 MiB physical VMEM.
    vmem_bytes = (2 * tb * F * x.dtype.itemsize        # x tiles (double-buffered)
                  + 2 * tb * out_features * 4          # output tiles
                  + tb * F * 2                         # in-kernel bf16 copy of x tile
                  + 4 * tb * hidden * 4)               # hidden activations (f32)
    vmem_limit = int(min(max(vmem_bytes + (8 << 20), 32 << 20), 48 << 20))

    return pl.pallas_call(
        mlp_kernel,
        out_shape=jax.ShapeDtypeStruct((B, out_features), jnp.float32),
        grid=grid,
        in_specs=in_specs,
        out_specs=out_spec,
        compiler_params=pltpu.CompilerParams(
            dimension_semantics=("parallel",),
            vmem_limit_bytes=vmem_limit,
        ),
        cost_estimate=cost,
    )(
        x,
        params["w1t"], params["b1"],
        params["w2t"], params["b2"],
        params["w3t"], params["b3"],
    )


def init_params(key, in_features=256, hidden=16, out_features=16):
    """PyTorch-style uniform init U(-1/sqrt(fan_in), 1/sqrt(fan_in)).

    Weights stored transposed (in, out) and as bf16 (MXU inputs); biases kept f32.
    """
    keys = jax.random.split(key, 6)

    def linear_init(kw, kb, fan_in, fan_out):
        bound = 1.0 / jnp.sqrt(jnp.float32(fan_in))
        wt = jax.random.uniform(kw, (fan_in, fan_out), jnp.float32, -bound, bound)
        b = jax.random.uniform(kb, (1, fan_out), jnp.float32, -bound, bound)
        return wt.astype(jnp.bfloat16), b

    w1t, b1 = linear_init(keys[0], keys[1], in_features, hidden)
    w2t, b2 = linear_init(keys[2], keys[3], hidden, hidden)
    w3t, b3 = linear_init(keys[4], keys[5], hidden, out_features)
    return {"w1t": w1t, "b1": b1, "w2t": w2t, "b2": b2, "w3t": w3t, "b3": b3}


def reference_forward(x, p):
    """f32 reference using the (bf16-stored) weight values upcast to f32."""
    xf = x.astype(jnp.float32)
    h = jnp.maximum(xf @ p["w1t"].astype(jnp.float32) + p["b1"], 0.0)
    h = jnp.maximum(h @ p["w2t"].astype(jnp.float32) + p["b2"], 0.0)
    return h @ p["w3t"].astype(jnp.float32) + p["b3"]


if __name__ == "__main__":
    key = jax.random.PRNGKey(0)
    k_x, k_p, k_x2 = jax.random.split(key, 3)

    B, IN_FEATURES = 8, 256  # 256 = 16*16 corr features (is_complex=True)
    params = init_params(k_p, in_features=IN_FEATURES, hidden=16, out_features=16)

    # Case 1: small f32 batch -> single tile; kernel casts x tile to bf16 in VMEM.
    x = jax.random.normal(k_x, (B, IN_FEATURES), dtype=jnp.float32)
    out = jax.block_until_ready(ffnn_small_forward(x, params))
    ref = reference_forward(x, params)
    assert out.shape == (B, 16)
    assert jnp.allclose(out, ref, atol=2e-2, rtol=2e-2), \
        float(jnp.max(jnp.abs(out - ref)))

    # Case 2: bf16 x shipped from HBM (halved read traffic), multi-step ragged grid:
    # B=72 with tb=16 -> grid of 5 steps, last block has 8 masked rows (no pad/slice).
    B2 = 72
    x2 = jax.random.normal(k_x2, (B2, IN_FEATURES), dtype=jnp.float32).astype(jnp.bfloat16)
    out2 = jax.block_until_ready(ffnn_small_forward(x2, params, block_b=16))
    ref2 = reference_forward(x2, params)
    assert out2.shape == (B2, 16)
    assert jnp.allclose(out2, ref2, atol=2e-2, rtol=2e-2), \
        float(jnp.max(jnp.abs(out2 - ref2)))

    print("KERNEL_OK")
</pallas_src>

<mosaic_0001>
module attributes {stable_mosaic.version = 11 : i64} {
  func.func @mlp_kernel(%arg0: i32, %arg1: memref<8x256xf32, #tpu.memory_space<vmem>>, %arg2: memref<256x16xbf16, #tpu.memory_space<vmem>>, %arg3: memref<1x16xf32, #tpu.memory_space<vmem>>, %arg4: memref<16x16xbf16, #tpu.memory_space<vmem>>, %arg5: memref<1x16xf32, #tpu.memory_space<vmem>>, %arg6: memref<16x16xbf16, #tpu.memory_space<vmem>>, %arg7: memref<1x16xf32, #tpu.memory_space<vmem>>, %arg8: memref<8x16xf32, #tpu.memory_space<vmem>>) attributes {dimension_semantics = [#tpu.dimension_semantics<parallel>], iteration_bounds = array<i64: 1>, scalar_prefetch = 0 : i64, scratch_operands = 0 : i64, tpu.core_type = #tpu.core_type<tc>, window_params = [{transform_indices = @transform_0, window_bounds = array<i64: 8, 256>}, {pipeline_mode = #tpu.pipeline_mode<synchronous>, transform_indices = @transform_1, window_bounds = array<i64: 256, 16>}, {pipeline_mode = #tpu.pipeline_mode<synchronous>, transform_indices = @transform_2, window_bounds = array<i64: 1, 16>}, {pipeline_mode = #tpu.pipeline_mode<synchronous>, transform_indices = @transform_3, window_bounds = array<i64: 16, 16>}, {pipeline_mode = #tpu.pipeline_mode<synchronous>, transform_indices = @transform_4, window_bounds = array<i64: 1, 16>}, {pipeline_mode = #tpu.pipeline_mode<synchronous>, transform_indices = @transform_5, window_bounds = array<i64: 16, 16>}, {pipeline_mode = #tpu.pipeline_mode<synchronous>, transform_indices = @transform_6, window_bounds = array<i64: 1, 16>}, {transform_indices = @transform_7, window_bounds = array<i64: 8, 16>}]} {
    %c0 = arith.constant 0 : index
    %c0_0 = arith.constant 0 : index
    %0 = vector.load %arg1[%c0, %c0_0] : memref<8x256xf32, #tpu.memory_space<vmem>>, vector<8x256xf32>
    %1 = arith.truncf %0 : vector<8x256xf32> to vector<8x256xbf16>
    %c0_1 = arith.constant 0 : index
    %c0_2 = arith.constant 0 : index
    %2 = vector.load %arg2[%c0_1, %c0_2] : memref<256x16xbf16, #tpu.memory_space<vmem>>, vector<256x16xbf16>
    %cst = arith.constant dense<0.000000e+00> : vector<8x16xf32>
    %3 = tpu.matmul %1, %2, %cst {dimension_numbers = #tpu.dot_dimension_numbers<[1], [0], [0], [1], [0, 0, 1, 1], [], []>} : vector<8x256xbf16>, vector<256x16xbf16>, vector<8x16xf32> -> vector<8x16xf32>
    %c0_3 = arith.constant 0 : index
    %c0_4 = arith.constant 0 : index
    %4 = vector.load %arg3[%c0_3, %c0_4] : memref<1x16xf32, #tpu.memory_space<vmem>>, vector<1x16xf32>
    %5 = vector.broadcast %4 : vector<1x16xf32> to vector<8x16xf32>
    %6 = arith.addf %3, %5 : vector<8x16xf32>
    %cst_5 = arith.constant 0.000000e+00 : f32
    %7 = vector.broadcast %cst_5 : f32 to vector<8x16xf32>
    %8 = arith.maximumf %6, %7 : vector<8x16xf32>
    %9 = arith.truncf %8 : vector<8x16xf32> to vector<8x16xbf16>
    %c0_6 = arith.constant 0 : index
    %c0_7 = arith.constant 0 : index
    %10 = vector.load %arg4[%c0_6, %c0_7] : memref<16x16xbf16, #tpu.memory_space<vmem>>, vector<16x16xbf16>
    %cst_8 = arith.constant dense<0.000000e+00> : vector<8x16xf32>
    %11 = tpu.matmul %9, %10, %cst_8 {dimension_numbers = #tpu.dot_dimension_numbers<[1], [0], [0], [1], [0, 0, 1, 1], [], []>} : vector<8x16xbf16>, vector<16x16xbf16>, vector<8x16xf32> -> vector<8x16xf32>
    %c0_9 = arith.constant 0 : index
    %c0_10 = arith.constant 0 : index
    %12 = vector.load %arg5[%c0_9, %c0_10] : memref<1x16xf32, #tpu.memory_space<vmem>>, vector<1x16xf32>
    %13 = vector.broadcast %12 : vector<1x16xf32> to vector<8x16xf32>
    %14 = arith.addf %11, %13 : vector<8x16xf32>
    %cst_11 = arith.constant 0.000000e+00 : f32
    %15 = vector.broadcast %cst_11 : f32 to vector<8x16xf32>
    %16 = arith.maximumf %14, %15 : vector<8x16xf32>
    %17 = arith.truncf %16 : vector<8x16xf32> to vector<8x16xbf16>
    %c0_12 = arith.constant 0 : index
    %c0_13 = arith.constant 0 : index
    %18 = vector.load %arg6[%c0_12, %c0_13] : memref<16x16xbf16, #tpu.memory_space<vmem>>, vector<16x16xbf16>
    %cst_14 = arith.constant dense<0.000000e+00> : vector<8x16xf32>
    %19 = tpu.matmul %17, %18, %cst_14 {dimension_numbers = #tpu.dot_dimension_numbers<[1], [0], [0], [1], [0, 0, 1, 1], [], []>} : vector<8x16xbf16>, vector<16x16xbf16>, vector<8x16xf32> -> vector<8x16xf32>
    %c0_15 = arith.constant 0 : index
    %c0_16 = arith.constant 0 : index
    %20 = vector.load %arg7[%c0_15, %c0_16] : memref<1x16xf32, #tpu.memory_space<vmem>>, vector<1x16xf32>
    %21 = vector.broadcast %20 : vector<1x16xf32> to vector<8x16xf32>
    %22 = arith.addf %19, %21 : vector<8x16xf32>
    %c0_17 = arith.constant 0 : index
    %c0_18 = arith.constant 0 : index
    %23 = vector.load %arg8[%c0_17, %c0_18] : memref<8x16xf32, #tpu.memory_space<vmem>>, vector<8x16xf32>
    tpu.vector_store %arg8[%c0_17, %c0_18], %22 {strides = array<i32>} : memref<8x16xf32, #tpu.memory_space<vmem>>, vector<8x16xf32>,
    return
  }
  func.func @transform_0(%arg0: i32) -> (i32, i32) {
    %c0_i32 = arith.constant 0 : i32
    %c0_i32_0 = arith.constant 0 : i32
    return %arg0, %c0_i32 : i32, i32
  }
  func.func @transform_1(%arg0: i32) -> (i32, i32) {
    %c0_i32 = arith.constant 0 : i32
    %c0_i32_0 = arith.constant 0 : i32
    %c0_i32_1 = arith.constant 0 : i32
    return %c0_i32, %c0_i32_0 : i32, i32
  }
  func.func @transform_2(%arg0: i32) -> (i32, i32) {
    %c0_i32 = arith.constant 0 : i32
    %c0_i32_0 = arith.constant 0 : i32
    %c0_i32_1 = arith.constant 0 : i32
    return %c0_i32, %c0_i32_0 : i32, i32
  }
  func.func @transform_3(%arg0: i32) -> (i32, i32) {
    %c0_i32 = arith.constant 0 : i32
    %c0_i32_0 = arith.constant 0 : i32
    %c0_i32_1 = arith.constant 0 : i32
    return %c0_i32, %c0_i32_0 : i32, i32
  }
  func.func @transform_4(%arg0: i32) -> (i32, i32) {
    %c0_i32 = arith.constant 0 : i32
    %c0_i32_0 = arith.constant 0 : i32
    %c0_i32_1 = arith.constant 0 : i32
    return %c0_i32, %c0_i32_0 : i32, i32
  }
  func.func @transform_5(%arg0: i32) -> (i32, i32) {
    %c0_i32 = arith.constant 0 : i32
    %c0_i32_0 = arith.constant 0 : i32
    %c0_i32_1 = arith.constant 0 : i32
    return %c0_i32, %c0_i32_0 : i32, i32
  }
  func.func @transform_6(%arg0: i32) -> (i32, i32) {
    %c0_i32 = arith.constant 0 : i32
    %c0_i32_0 = arith.constant 0 : i32
    %c0_i32_1 = arith.constant 0 : i32
    return %c0_i32, %c0_i32_0 : i32, i32
  }
  func.func @transform_7(%arg0: i32) -> (i32, i32) {
    %c0_i32 = arith.constant 0 : i32
    %c0_i32_0 = arith.constant 0 : i32
    return %arg0, %c0_i32 : i32, i32
  }
}

</mosaic_0001>

<bundles_post_ra>
// kernel: tpu_custom_call.1
= control target key start
LH: loop header
LB: loop body
LE: loop exit
PB: predicated region body
PF: predicated region fallthrough
CT: control target
= control target key end

     0   :  { %s576_s0 = inlined_call_operand.vmem [shape: f32[8,256], index: 0, kind: input, shape index: {}]   ;;  %s577_s1 = inlined_call_operand.vmem [shape: bf16[256,16], index: 1, kind: input, shape index: {}]   ;;  %s578_s2 = inlined_call_operand.vmem [shape: f32[1,16], index: 2, kind: input, shape index: {}]   ;;  %s579_s3 = inlined_call_operand.vmem [shape: bf16[16,16], index: 3, kind: input, shape index: {}]   ;;  %s580_s4 = inlined_call_operand.vmem [shape: f32[1,16], index: 4, kind: input, shape index: {}]   ;;  %s581_s5 = inlined_call_operand.vmem [shape: bf16[16,16], index: 5, kind: input, shape index: {}]   ;;  %s582_s6 = inlined_call_operand.vmem [shape: f32[1,16], index: 6, kind: input, shape index: {}]   ;;  %s583_s7 = inlined_call_operand.hbm [shape: f32[8,16], index: 7, kind: output, shape index: {}]  }
   0x1   :  { %v407_v0 = vld [vmem:[%s577_s1 + $0x40] sm:$0xff]   ;;  %v409_v2 = vld [vmem:[%s577_s1 + $0x48] sm:$0xff]   ;;  %v411_v4 = vld [vmem:[%s577_s1 + $0x50] sm:$0xff]  }
   0x2   :  { %v408_v1 = vld [vmem:[%s577_s1] sm:$0xff]   ;;  %366 = vmatprep.subr.bf16.mxu0 %v407_v0  ;;  %v410_v3 = vld [vmem:[%s577_s1 + $0x8] sm:$0xff]   ;;  %v412_v5 = vld [vmem:[%s577_s1 + $0x10] sm:$0xff]  }
   0x3   :  { %367 = vmatpush3.bf16.msra.mxu0 %v408_v1  ;;  %v413_v6 = vld [vmem:[%s577_s1 + $0x58] sm:$0xff]   ;;  %v415_v8 = vld [vmem:[%s577_s1 + $0x60] sm:$0xff]   ;;  %v417_v10 = vld [vmem:[%s577_s1 + $0x68] sm:$0xff]  }
   0x4   :  { %368 = vmatprep.subr.bf16.mxu0 %v409_v2  ;;  %v414_v7 = vld [vmem:[%s577_s1 + $0x18] sm:$0xff]   ;;  %v416_v9 = vld [vmem:[%s577_s1 + $0x20] sm:$0xff]   ;;  %v29_v11 = vld [vmem:[%s576_s0 + $0x8] sm:$0xff] }
   0x5   :  { %v31_v12 = vpack.c.bf16 %v29_v11, %v29_v11 }
   0x7   :  { %369 = vmatpush3.bf16.msra.mxu0 %v410_v3 }
   0x8   :  { %370 = vmatprep.subr.bf16.mxu0 %v411_v4 }
   0xb   :  { %371 = vmatpush3.bf16.msra.mxu0 %v412_v5 }
   0xc   :  { %372 = vmatprep.subr.bf16.mxu0 %v413_v6 }
   0xf   :  { %373 = vmatpush3.bf16.msra.mxu0 %v414_v7 }
  0x10   :  { %374 = vmatprep.subr.bf16.mxu0 %v415_v8 }
  0x11   :  { %12 = vsyncpa [#allocation3], 0  ;;  %v418_v13 = vld [vmem:[%s577_s1 + $0x28] sm:$0xff]   ;;  %199 = vmatprep.mubr.bf16.mxu0 %v31_v12  ;;  %v419_v14 = vld [vmem:[%s577_s1 + $0x70] sm:$0xff]   ;;  %v449_v21 = vmov 0.0   ;;  %vm450_vm0 = vmmov 0  }
  0x12   :  { %v420_v15 = vld [vmem:[%s577_s1 + $0x30] sm:$0xff]   ;;  %v421_v16 = vld [vmem:[%s577_s1 + $0x78] sm:$0xff]   ;;  %v28_v18 = vld [vmem:[%s576_s0] sm:$0xff]  ;;  %392 = vmatprep.subr.bf16.mxu1 %v449_v21  ;;  %394 = vmatprep.mubr.msk.bf16.mxu1 %vm450_vm0, %v449_v21  ;;  %vm224_vm1 = vcmask 130048   ;;  %s451_s19 = smov [#allocation2]  }
  0x13   :  { %375 = vmatpush3.bf16.msra.mxu0 %v416_v9  ;;  %v422_v17 = vld [vmem:[%s577_s1 + $0x38] sm:$0xff]   ;;  %v30_v19 = vpack.c.bf16 %v28_v18, %v28_v18  ;;  %v423_v20 = vld [vmem:[%s579_s3] sm:$0xff]   ;;  %s335_s20 = sshll.u32 %s451_s19, 4  ;;  %s336_s20 = int_to_ptr.vmem [resolvable:$true] %s335_s20 }
  0x14   :  { %376 = vmatprep.subr.bf16.mxu0 %v417_v10  ;;  %393 = vmatpush3.bf16.msra.mxu1 %v423_v20  ;;  %v343_v23 = vld [vmem:[%s578_s2] ss:$0 sm:$0xff]  ;;  %p430_p1 = scmp.lt.s32.totalorder %s336_s20, %s336_s20 }
  0x15   :  { %398 = vmatprep.subr.bf16.mxu1 %v449_v21  ;;  %v424_v30 = vld [vmem:[%s581_s5] sm:$0xff]  }
  0x16   :  { %v360_v32 = vld [vmem:[%s580_s4] ss:$0 sm:$0xff]  ;;  %s425_s4 = scalar_lea.vmem %s336_s20, 128 }
  0x17   :  { %377 = vmatpush3.bf16.msra.mxu0 %v418_v13  ;;  %v363_v40 = vld [vmem:[%s582_s6] ss:$0 sm:$0xff]  ;;  %p426_p0 = scmp.ne.s32.totalorder %s336_s20, %s425_s4  ;;  %p431_p2 = scmp.lt.s32.totalorder %s425_s4, %s425_s4 }
  0x18   :  { %378 = vmatprep.subr.bf16.mxu0 %v419_v14 }
  0x19   :  { %p432_p3 = por %p431_p2, %p430_p1 }
  0x1b   :  { %379 = vmatpush3.bf16.msra.mxu0 %v420_v15  ;;  %p433_p4 = pnand %p432_p3, %p426_p0 }
  0x1c   :  { %380 = vmatprep.subr.bf16.mxu0 %v421_v16 }
  0x1f   :  { %381 = vmatpush3.bf16.msra.mxu0 %v422_v17 }
  0x22   :  { %200 = vmatmul.mubr.bf16.vlgmr.msra.gmra.mrb[0].mxu0 %v30_v19 }
  0xf5   :  { %v382_v22 = vpop.f32.mrb[0].mxu0 }
  0xf6   :  { %v383_v24 = vpop.f32.mrb[1].mxu0 }
  0xf7   :  { %v384_v25 = vadd.f32 %v383_v24, %v382_v22  ;;  %v385_v26 = vpop.f32.mrb[2].mxu0 }
  0xf8   :  { %v386_v27 = vpop.f32.mrb[3].mxu0 }
  0xf9   :  { %v202_v28 = vadd.f32 %v384_v25, %v343_v23 }
  0xfb   :  { %v207_v29 = vmax.f32 %v202_v28, 0.0 }
  0xfd   :  { %v208_v31 = vpack.c.bf16 %v207_v29, %v207_v29 }
  0xff   :  { %395 = vmatmul.mubr.msk.bf16.vlgmr.msra.gmra.mrb[0].mxu1 %vm224_vm1, %v208_v31 }
 0x100   :  { %399 = vmatpush3.bf16.msra.mxu1 %v424_v30  ;;  %400 = vmatprep.mubr.msk.bf16.mxu1 %vm450_vm0, %v449_v21 }
 0x1d2   :  { %v262_v33 = vpop.f32.mrb[0].mxu1 }
 0x1d3   :  { %v263_v34 = vadd.f32 %v360_v32, %v262_v33  ;;  %v396_v35 = vpop.f32.mrb[1].mxu1 }
 0x1d4   :  { %v265_v36 = vpop.f32.mrb[2].mxu1 }
 0x1d5   :  { %v268_v37 = vmax.f32 %v263_v34, 0.0  ;;  %v397_v38 = vpop.f32.mrb[3].mxu1 }
 0x1d7   :  { %v269_v39 = vpack.c.bf16 %v268_v37, %v268_v37 }
 0x1d9   :  { %401 = vmatmul.mubr.msk.bf16.vlgmr.msra.gmra.mrb[4].mxu1 %vm224_vm1, %v269_v39 }
 0x2ac   :  { %v322_v41 = vpop.f32.mrb[4].mxu1 }
 0x2ad   :  { %v323_v42 = vadd.f32 %v363_v40, %v322_v41  ;;  %v402_v43 = vpop.f32.mrb[5].mxu1 }
 0x2ae   :  { %v325_v44 = vpop.f32.mrb[6].mxu1 }
 0x2af   :  { %328 = vst.msk [vmem:[#allocation2] sm:$0xff] %vm224_vm1, %v323_v42  ;;  %v403_v45 = vpop.f32.mrb[7].mxu1 }
 0x2b0   :  { %436 = shalt.err (!%p433_p4)
}
 0x2b1   :  { %s437_s6 = scalar_lea.hbm %s583_s7, 128 }
 0x2b2   :  { %p438_p5 = scmp.ne.s32.totalorder %s583_s7, %s437_s6  ;;  %p441_p6 = scmp.lt.u32.totalorder %s437_s6, %s583_s7 }
 0x2b4   :  { %p443_p7 = pnand %p441_p6, %p438_p5 }
 0x2b6   :  { %446 = shalt.err (!%p443_p7)
}
 0x2b7   :  { %338 = dma.vmem_to_hbm [thread:$0]  %s336_s20, 128, %s583_s7, [#allocation3]  }
 0x2b8   :  { %447 = dma.done.wait [#allocation3], 128  }
 0x2b9   :  { %448 = vsyncadd [#allocation3], 4294967168 }
 0x2ba   :  { %342 = vsyncpa [#allocation3], 1 }

</bundles_post_ra>
